<compile_context>
chip_gen: v7x
topology: tpu7x:2x2x1
jax: 0.10.0
libtpu: 0.0.40
codegen_flags: <defaults>
</compile_context>

<pallas_src>
import jax
import jax.numpy as jnp
from jax.experimental import pallas as pl
from jax.experimental.pallas import tpu as pltpu


def _copy_kernel(x_ref, o_ref):
    # Straight VMEM tile copy: out tile = in tile.
    o_ref[...] = x_ref[...]


_SINGLE_BLOCK_BYTES = 512 * 1024            # below this: one block, no grid
_WHOLE_ARRAY_FALLBACK_BYTES = 2 * 1024 * 1024  # non-128-divisible small fallback
_TARGET_TILE_BYTES = 4 * 1024 * 1024        # tiled streaming-copy block size
_VMEM_LIMIT_BYTES = 32 * 1024 * 1024        # explicit headroom for 4x tile bytes
_LANE_CANDIDATES = (2048, 1024, 512, 256, 128)


def _sublane_multiple(itemsize):
    # f32 -> 8, bf16 -> 16, int8/fp8 -> 32 (packed dtypes tile sublanes in
    # pairs/quads; keep the second-to-last block dim aligned to that).
    return max(8, 32 // itemsize)


def _pick_lane(total, sub):
    """Widest lane (multiple of 128) dividing `total`, preferring row counts
    that are a multiple of the sublane pack factor (unmasked full-vreg vst)."""
    widest_divisible = None
    for lane in _LANE_CANDIDATES:
        if total % lane == 0:
            if widest_divisible is None:
                widest_divisible = lane
            if (total // lane) % sub == 0:
                return lane
    return widest_divisible  # None only if total % 128 != 0


def _identity_copy(x):
    """Materialized identity copy of x via a lane-dense Pallas copy kernel."""
    total = x.size
    if total == 0:
        return x

    dtype = x.dtype
    itemsize = dtype.itemsize
    nbytes = total * itemsize
    sub = _sublane_multiple(itemsize)

    if total % 128 != 0:
        # Element count not lane-divisible: copy as ONE full-array block in the
        # original N-D shape (block == full array dims is always legal). Never
        # present a (1, total) slab (8x sublane padding would blow VMEM).
        if nbytes <= _WHOLE_ARRAY_FALLBACK_BYTES:
            return pl.pallas_call(
                _copy_kernel,
                out_shape=jax.ShapeDtypeStruct(x.shape, dtype),
            )(x)
        # TODO(synk): tile large non-128-divisible tensors (divisible prefix
        # through the tiled kernel + tiny tail kernel); identity path below is
        # still value-correct.
        return x

    lane = _pick_lane(total, sub)
    rows = total // lane
    x2 = x.reshape(rows, lane)

    # ---------- Small path: single whole-array block (no grid). ----------
    if nbytes <= _SINGLE_BLOCK_BYTES:
        out = pl.pallas_call(
            _copy_kernel,
            out_shape=jax.ShapeDtypeStruct((rows, lane), dtype),
        )(x2)
        return out.reshape(x.shape)

    # ---------- Large path: lane-dense tiled streaming copy. ----------
    tm = max(sub, (_TARGET_TILE_BYTES // (lane * itemsize)) // sub * sub)
    tm = min(tm, ((rows + sub - 1) // sub) * sub)   # never allocate beyond rows
    grid = (pl.cdiv(rows, tm),)                     # partial edge block is masked

    out = pl.pallas_call(
        _copy_kernel,
        out_shape=jax.ShapeDtypeStruct((rows, lane), dtype),
        grid_spec=pltpu.PrefetchScalarGridSpec(
            num_scalar_prefetch=0,
            grid=grid,
            in_specs=[pl.BlockSpec((tm, lane), lambda i: (i, 0))],
            out_specs=pl.BlockSpec((tm, lane), lambda i: (i, 0)),
        ),
        compiler_params=pltpu.CompilerParams(
            dimension_semantics=("parallel",),      # v7x: shard steps over 2 TCs
            vmem_limit_bytes=_VMEM_LIMIT_BYTES,
        ),
    )(x2)
    return out.reshape(x.shape)


def print_layer(x, materialize=False):
    """Pallas equivalent of PrintLayer.forward: print shape, return x.

    The shape print happens at trace time (shapes are static in JAX); under
    jit it prints once per compilation rather than once per call.
    The default path returns x with no kernel launch (a copy kernel would add
    >= 2x tensor bytes of HBM traffic for nothing).  Pass materialize=True to
    force an independent copy through the Pallas identity-copy kernel.
    """
    print(x.shape)
    if not materialize:
        return x
    return _identity_copy(x)


if __name__ == "__main__":
    key = jax.random.PRNGKey(0)
    # Small NCHW input consistent with how PrintLayer is used in a conv stack.
    x = jax.random.normal(key, (2, 4, 16, 16), dtype=jnp.float32)

    # Hot path: pure identity, no kernel launch.
    y = jax.block_until_ready(print_layer(x))
    assert y.shape == x.shape
    assert y.dtype == x.dtype
    assert bool(jnp.all(y == x))

    # Materialized-copy path: exercises the Pallas identity-copy kernel once.
    y_copy = jax.block_until_ready(print_layer(x, materialize=True))
    assert y_copy.shape == x.shape
    assert y_copy.dtype == x.dtype
    assert bool(jnp.all(y_copy == x))

    print("KERNEL_OK")
</pallas_src>

<mosaic_0001>
module attributes {stable_mosaic.version = 11 : i64} {
  func.func @_copy_kernel(%arg0: memref<8x256xf32, #tpu.memory_space<vmem>>, %arg1: memref<8x256xf32, #tpu.memory_space<vmem>>) attributes {dimension_semantics = [], scalar_prefetch = 0 : i64, scratch_operands = 0 : i64, tpu.core_type = #tpu.core_type<tc>} {
    %c0 = arith.constant 0 : index
    %c0_0 = arith.constant 0 : index
    %0 = vector.load %arg0[%c0, %c0_0] : memref<8x256xf32, #tpu.memory_space<vmem>>, vector<8x256xf32>
    %c0_1 = arith.constant 0 : index
    %c0_2 = arith.constant 0 : index
    %1 = vector.load %arg1[%c0_1, %c0_2] : memref<8x256xf32, #tpu.memory_space<vmem>>, vector<8x256xf32>
    tpu.vector_store %arg1[%c0_1, %c0_2], %0 {strides = array<i32>} : memref<8x256xf32, #tpu.memory_space<vmem>>, vector<8x256xf32>,
    return
  }
}

</mosaic_0001>

<bundles_post_ra>
// kernel: tpu_custom_call.1
= control target key start
LH: loop header
LB: loop body
LE: loop exit
PB: predicated region body
PF: predicated region fallthrough
CT: control target
= control target key end

     0   :  { %6 = vsyncpa [#allocation3], 0  ;;  %s126_s0 = inlined_call_operand.hbm [shape: f32[8,256], index: 0, kind: input, shape index: {}]   ;;  %s127_s1 = inlined_call_operand.hbm [shape: f32[8,256], index: 1, kind: output, shape index: {}]  }
   0x1   :  { %7 = vsyncpa [#allocation4], 0  ;;  %s90_s6 = smov [#allocation2]   ;;  %s42_s10 = scalar_lea.hbm %s126_s0, 256 }
   0x2   :  { %s14_s7 = sshll.u32 %s90_s6, 4  ;;  %p43_p0 = scmp.ne.s32.totalorder %s126_s0, %s42_s10  ;;  %s15_s7 = int_to_ptr.vmem [resolvable:$true] %s14_s7 }
   0x3   :  { %p46_p1 = scmp.lt.u32.totalorder %s42_s10, %s126_s0 }
   0x5   :  { %p48_p2 = pnand %p46_p1, %p43_p0 }
   0x7   :  { %51 = shalt.err (!%p48_p2)
}
   0x8   :  { %s52_s15 = scalar_lea.vmem %s15_s7, 256  ;;  %p57_p4 = scmp.lt.s32.totalorder %s15_s7, %s15_s7 }
   0x9   :  { %p53_p3 = scmp.ne.s32.totalorder %s15_s7, %s52_s15  ;;  %p58_p5 = scmp.lt.s32.totalorder %s52_s15, %s52_s15 }
   0xb   :  { %p59_p6 = por %p58_p5, %p57_p4 }
   0xd   :  { %p60_p7 = pnand %p59_p6, %p53_p3 }
   0xf   :  { %63 = shalt.err (!%p60_p7)
}
  0x10   :  { %17 = dma.hbm_to_vmem [thread:$0]  %s126_s0, 256, %s15_s7, [#allocation3]  }
  0x11   :  { %86 = dma.done.wait [#allocation3], 256  }
  0x12   :  { %87 = vsyncadd [#allocation3], 4294967040  ;;  %s91_s18 = smov [#allocation5]   ;;  %v21_v0 = vld [vmem:[#allocation2] sm:$0xff]  ;;  %v22_v1 = vld [vmem:[#allocation2 + $0x8] sm:$0xff] }
  0x13   :  { %s31_s19 = sshll.u32 %s91_s18, 4  ;;  %23 = vst [vmem:[#allocation5] sm:$0xff] %v21_v0  ;;  %24 = vst [vmem:[#allocation5 + $0x8] sm:$0xff] %v22_v1  ;;  %s32_s19 = int_to_ptr.vmem [resolvable:$true] %s31_s19 }
  0x14   :  { %s64_s20 = scalar_lea.vmem %s32_s19, 256  ;;  %p69_p9 = scmp.lt.s32.totalorder %s32_s19, %s32_s19 }
  0x15   :  { %p65_p8 = scmp.ne.s32.totalorder %s32_s19, %s64_s20  ;;  %p70_p10 = scmp.lt.s32.totalorder %s64_s20, %s64_s20 }
  0x17   :  { %p71_p11 = por %p70_p10, %p69_p9 }
  0x19   :  { %p72_p12 = pnand %p71_p11, %p65_p8 }
  0x1b   :  { %75 = shalt.err (!%p72_p12)
}
  0x1c   :  { %s76_s0 = scalar_lea.hbm %s127_s1, 256 }
  0x1d   :  { %p77_p13 = scmp.ne.s32.totalorder %s127_s1, %s76_s0  ;;  %p80_p0 = scmp.lt.u32.totalorder %s76_s0, %s127_s1 }
  0x1f   :  { %p82_p1 = pnand %p80_p0, %p77_p13 }
  0x21   :  { %85 = shalt.err (!%p82_p1)
}
  0x22   :  { %34 = dma.vmem_to_hbm [thread:$0]  %s32_s19, 256, %s127_s1, [#allocation4]  }
  0x23   :  { %88 = dma.done.wait [#allocation4], 256  }
  0x24   :  { %89 = vsyncadd [#allocation4], 4294967040 }
  0x25   :  { %38 = vsyncpa [#allocation3], 1 }
  0x26   :  { %39 = vsyncpa [#allocation4], 1 }

</bundles_post_ra>
